<compile_context>
chip_gen: v7x
topology: tpu7x:2x2x1
jax: 0.10.0
libtpu: 0.0.40
codegen_flags: <defaults>
</compile_context>

<pallas_src>
import functools

import jax
import jax.numpy as jnp
from jax import lax
from jax.experimental import pallas as pl
from jax.experimental.pallas import tpu as pltpu


def _mha_fused_kernel(
    x_q_ref,      # (1, tq, D)  query-rows slab of x
    x_full_ref,   # (1, T, D)   full-sequence slab of x (for K/V)
    wq_ref,       # (D, D)      stacked per-head query weights
    wkv_ref,      # (D, 2D)     stacked per-head key|value weights
    wp_ref,       # (D, D)      output projection weight
    o_ref,        # (1, tq, D)  output slab
    k_scr,        # VMEM (T, D) bf16 scratch: keys for the whole sequence
    v_scr,        # VMEM (T, D) bf16 scratch: values for the whole sequence
    *,
    num_heads,
    head_size,
    q_block,
):
    D = x_full_ref.shape[-1]
    T = x_full_ref.shape[1]
    tq = q_block
    H, Hd = num_heads, head_size
    scale = head_size ** (-0.5)

    qi = pl.program_id(1)

    # ---- project K and V for the whole sequence once per batch element ----
    @pl.when(qi == 0)
    def _():
        xf = x_full_ref[0].astype(jnp.bfloat16)                       # (T, D)
        wkv = wkv_ref[...].astype(jnp.bfloat16)                       # (D, 2D)
        kv = jnp.dot(xf, wkv, preferred_element_type=jnp.float32)     # (T, 2D)
        k_scr[...] = kv[:, :D].astype(jnp.bfloat16)
        v_scr[...] = kv[:, D:].astype(jnp.bfloat16)

    # ---- project Q for this query block (all heads in one matmul) ----
    xq = x_q_ref[0].astype(jnp.bfloat16)                              # (tq, D)
    wq = wq_ref[...].astype(jnp.bfloat16)                             # (D, D)
    q_all = jnp.dot(xq, wq, preferred_element_type=jnp.float32)       # (tq, D)
    q_all = q_all.astype(jnp.bfloat16)

    k_all = k_scr[...]                                                # (T, D) bf16
    v_all = v_scr[...]                                                # (T, D) bf16

    # Causal mask for this query block (hoisted out of the per-head loop).
    row = lax.broadcasted_iota(jnp.int32, (tq, T), 0) + qi * tq
    col = lax.broadcasted_iota(jnp.int32, (tq, T), 1)
    causal = col <= row

    # ---- per-head attention; concat order matches torch.cat(dim=-1) ----
    head_outs = []
    for h in range(H):
        hs = h * Hd
        q_h = q_all[:, hs:hs + Hd]                                    # (tq, Hd)
        k_h = k_all[:, hs:hs + Hd]                                    # (T, Hd)
        v_h = v_all[:, hs:hs + Hd]                                    # (T, Hd)

        # scores = q @ k^T * Hd^-0.5, contracted on the head dim (no transpose).
        s = lax.dot_general(
            q_h, k_h, (((1,), (1,)), ((), ())),
            preferred_element_type=jnp.float32,
        ) * scale                                                     # (tq, T) f32
        s = jnp.where(causal, s, -jnp.inf)

        # numerically stable softmax (f32); 1/l folded into the PV output.
        m = jnp.max(s, axis=-1, keepdims=True)
        p = jnp.exp(s - m)
        l = jnp.sum(p, axis=-1, keepdims=True)
        o_h = jnp.dot(p.astype(jnp.bfloat16), v_h,
                      preferred_element_type=jnp.float32)             # (tq, Hd)
        o_h = o_h * pl.reciprocal(l, approx=True)
        head_outs.append(o_h)

    o_cat = jnp.concatenate(head_outs, axis=-1).astype(jnp.bfloat16)  # (tq, D)

    # ---- fused output projection, written lane-dense as (tq, D) ----
    wp = wp_ref[...].astype(jnp.bfloat16)
    out = jnp.dot(o_cat, wp, preferred_element_type=jnp.float32)      # (tq, D)
    o_ref[0] = out.astype(o_ref.dtype)


def multi_head_attention(x, wq, wk, wv, wp, *, q_block=128):
    """x: (B, T, D); wq/wk/wv: (H, D, Hd); wp: (D, D). Returns (B, T, D)."""
    B, T, D = x.shape
    H, D2, Hd = wq.shape
    assert D2 == D and H * Hd == D, "attn_heads * head_size must equal hidden_size"

    tq = T if T <= q_block else q_block
    assert T % tq == 0, "sequence length must be a multiple of the query tile"
    nq = T // tq

    # Stack per-head weights:  wq_flat[:, h*Hd:(h+1)*Hd] == wq[h]  (concat order).
    wq_flat = jnp.transpose(wq, (1, 0, 2)).reshape(D, D)
    wk_flat = jnp.transpose(wk, (1, 0, 2)).reshape(D, D)
    wv_flat = jnp.transpose(wv, (1, 0, 2)).reshape(D, D)
    wkv = jnp.concatenate([wk_flat, wv_flat], axis=-1)                # (D, 2D)

    kernel = functools.partial(
        _mha_fused_kernel, num_heads=H, head_size=Hd, q_block=tq)

    # TODO(synk): for very long sequences, add causal KV-block skipping and
    # re-derive tile sizes against v7x's 64 MiB VMEM (K/V scratch is (T, D) bf16).
    return pl.pallas_call(
        kernel,
        out_shape=jax.ShapeDtypeStruct((B, T, D), x.dtype),
        grid=(B, nq),
        in_specs=[
            pl.BlockSpec((1, tq, D), lambda b, qi: (b, qi, 0)),   # x (query rows)
            pl.BlockSpec((1, T, D), lambda b, qi: (b, 0, 0)),     # x (full, for K/V)
            pl.BlockSpec((D, D), lambda b, qi: (0, 0)),           # Wq stacked
            pl.BlockSpec((D, 2 * D), lambda b, qi: (0, 0)),       # Wk|Wv stacked
            pl.BlockSpec((D, D), lambda b, qi: (0, 0)),           # Wp
        ],
        out_specs=pl.BlockSpec((1, tq, D), lambda b, qi: (b, qi, 0)),
        scratch_shapes=[
            pltpu.VMEM((T, D), jnp.bfloat16),   # K for the whole sequence
            pltpu.VMEM((T, D), jnp.bfloat16),   # V for the whole sequence
        ],
        compiler_params=pltpu.CompilerParams(
            dimension_semantics=("parallel", "arbitrary"),
        ),
    )(x, x, wq_flat, wkv, wp)


def _reference(x, wq, wk, wv, wp):
    """Pure-JAX f32 reference matching the PyTorch forward semantics."""
    B, T, D = x.shape
    H, _, Hd = wq.shape
    outs = []
    mask = jnp.tril(jnp.ones((T, T), dtype=bool))
    for h in range(H):
        q = x @ wq[h]
        k = x @ wk[h]
        v = x @ wv[h]
        s = (q @ jnp.swapaxes(k, -2, -1)) * (Hd ** -0.5)
        s = jnp.where(mask, s, -jnp.inf)
        p = jax.nn.softmax(s, axis=-1)
        outs.append(p @ v)
    concat = jnp.concatenate(outs, axis=-1)
    return concat @ wp


if __name__ == "__main__":
    # Small shapes consistent with the module: hidden=32, heads=4, head_size=8.
    B, T, D, H = 2, 8, 32, 4
    Hd = D // H

    key = jax.random.PRNGKey(0)
    kx, kq, kk, kv, kp = jax.random.split(key, 5)

    x = jax.random.normal(kx, (B, T, D), dtype=jnp.float32)
    # Deterministic "parameter" init (stands in for nn.Linear weights; stored
    # pre-transposed so kernels compute x @ W).
    scale = D ** -0.5
    wq = jax.random.normal(kq, (H, D, Hd), dtype=jnp.float32) * scale
    wk = jax.random.normal(kk, (H, D, Hd), dtype=jnp.float32) * scale
    wv = jax.random.normal(kv, (H, D, Hd), dtype=jnp.float32) * scale
    wp = jax.random.normal(kp, (D, D), dtype=jnp.float32) * scale

    out = jax.jit(multi_head_attention)(x, wq, wk, wv, wp)
    out = jax.block_until_ready(out)

    ref = _reference(x, wq, wk, wv, wp)
    assert out.shape == (B, T, D)
    # bf16 MXU operands with f32 accumulation -> compare with a loosened tolerance.
    max_err = float(jnp.max(jnp.abs(out - ref)))
    assert jnp.allclose(out, ref, atol=5e-2, rtol=5e-2), (
        f"mismatch vs reference, max abs err = {max_err}")

    print("KERNEL_OK")
</pallas_src>

<mosaic_0001>
module attributes {stable_mosaic.version = 11 : i64} {
  func.func @_mha_fused_kernel(%arg0: i32, %arg1: i32, %arg2: memref<1x8x32xf32, #tpu.memory_space<vmem>>, %arg3: memref<1x8x32xf32, #tpu.memory_space<vmem>>, %arg4: memref<32x32xf32, #tpu.memory_space<vmem>>, %arg5: memref<32x64xf32, #tpu.memory_space<vmem>>, %arg6: memref<32x32xf32, #tpu.memory_space<vmem>>, %arg7: memref<1x8x32xf32, #tpu.memory_space<vmem>>, %arg8: memref<8x32xbf16, #tpu.memory_space<vmem>>, %arg9: memref<8x32xbf16, #tpu.memory_space<vmem>>) attributes {dimension_semantics = [#tpu.dimension_semantics<parallel>, #tpu.dimension_semantics<arbitrary>], iteration_bounds = array<i64: 2, 1>, scalar_prefetch = 0 : i64, scratch_operands = 2 : i64, tpu.core_type = #tpu.core_type<tc>, window_params = [{transform_indices = @transform_0, window_bounds = array<i64: 1, 8, 32>}, {transform_indices = @transform_1, window_bounds = array<i64: 1, 8, 32>}, {pipeline_mode = #tpu.pipeline_mode<synchronous>, transform_indices = @transform_2, window_bounds = array<i64: 32, 32>}, {pipeline_mode = #tpu.pipeline_mode<synchronous>, transform_indices = @transform_3, window_bounds = array<i64: 32, 64>}, {pipeline_mode = #tpu.pipeline_mode<synchronous>, transform_indices = @transform_4, window_bounds = array<i64: 32, 32>}, {transform_indices = @transform_5, window_bounds = array<i64: 1, 8, 32>}]} {
    %c0_i32 = arith.constant 0 : i32
    %0 = arith.cmpi eq, %arg1, %c0_i32 : i32
    %1 = arith.extui %0 : i1 to i32
    %c0_i32_0 = arith.constant 0 : i32
    %2 = arith.cmpi ne, %1, %c0_i32_0 : i32
    scf.if %2 {
      %c0_39 = arith.constant 0 : index
      %c0_40 = arith.constant 0 : index
      %c0_41 = arith.constant 0 : index
      %106 = vector.load %arg3[%c0_39, %c0_40, %c0_41] : memref<1x8x32xf32, #tpu.memory_space<vmem>>, vector<1x8x32xf32>
      %107 = vector.shape_cast %106 : vector<1x8x32xf32> to vector<8x32xf32>
      %108 = arith.truncf %107 : vector<8x32xf32> to vector<8x32xbf16>
      %c0_42 = arith.constant 0 : index
      %c0_43 = arith.constant 0 : index
      %109 = vector.load %arg5[%c0_42, %c0_43] : memref<32x64xf32, #tpu.memory_space<vmem>>, vector<32x64xf32>
      %110 = arith.truncf %109 : vector<32x64xf32> to vector<32x64xbf16>
      %cst_44 = arith.constant dense<0.000000e+00> : vector<8x64xf32>
      %111 = tpu.matmul %108, %110, %cst_44 {dimension_numbers = #tpu.dot_dimension_numbers<[1], [0], [0], [1], [0, 0, 1, 1], [], []>} : vector<8x32xbf16>, vector<32x64xbf16>, vector<8x64xf32> -> vector<8x64xf32>
      %112 = vector.extract_strided_slice %111 {offsets = [0, 0], sizes = [8, 32], strides = [1, 1]} : vector<8x64xf32> to vector<8x32xf32>
      %113 = arith.truncf %112 : vector<8x32xf32> to vector<8x32xbf16>
      %c0_45 = arith.constant 0 : index
      %c0_46 = arith.constant 0 : index
      %114 = vector.load %arg8[%c0_45, %c0_46] : memref<8x32xbf16, #tpu.memory_space<vmem>>, vector<8x32xbf16>
      tpu.vector_store %arg8[%c0_45, %c0_46], %113 {strides = array<i32>} : memref<8x32xbf16, #tpu.memory_space<vmem>>, vector<8x32xbf16>,
      %115 = vector.extract_strided_slice %111 {offsets = [0, 32], sizes = [8, 32], strides = [1, 1]} : vector<8x64xf32> to vector<8x32xf32>
      %116 = arith.truncf %115 : vector<8x32xf32> to vector<8x32xbf16>
      %c0_47 = arith.constant 0 : index
      %c0_48 = arith.constant 0 : index
      %117 = vector.load %arg9[%c0_47, %c0_48] : memref<8x32xbf16, #tpu.memory_space<vmem>>, vector<8x32xbf16>
      tpu.vector_store %arg9[%c0_47, %c0_48], %116 {strides = array<i32>} : memref<8x32xbf16, #tpu.memory_space<vmem>>, vector<8x32xbf16>,
    } else {
    }
    %c0 = arith.constant 0 : index
    %c0_1 = arith.constant 0 : index
    %c0_2 = arith.constant 0 : index
    %3 = vector.load %arg2[%c0, %c0_1, %c0_2] : memref<1x8x32xf32, #tpu.memory_space<vmem>>, vector<1x8x32xf32>
    %4 = vector.shape_cast %3 : vector<1x8x32xf32> to vector<8x32xf32>
    %5 = arith.truncf %4 : vector<8x32xf32> to vector<8x32xbf16>
    %c0_3 = arith.constant 0 : index
    %c0_4 = arith.constant 0 : index
    %6 = vector.load %arg4[%c0_3, %c0_4] : memref<32x32xf32, #tpu.memory_space<vmem>>, vector<32x32xf32>
    %7 = arith.truncf %6 : vector<32x32xf32> to vector<32x32xbf16>
    %cst = arith.constant dense<0.000000e+00> : vector<8x32xf32>
    %8 = tpu.matmul %5, %7, %cst {dimension_numbers = #tpu.dot_dimension_numbers<[1], [0], [0], [1], [0, 0, 1, 1], [], []>} : vector<8x32xbf16>, vector<32x32xbf16>, vector<8x32xf32> -> vector<8x32xf32>
    %9 = arith.truncf %8 : vector<8x32xf32> to vector<8x32xbf16>
    %c0_5 = arith.constant 0 : index
    %c0_6 = arith.constant 0 : index
    %10 = vector.load %arg8[%c0_5, %c0_6] : memref<8x32xbf16, #tpu.memory_space<vmem>>, vector<8x32xbf16>
    %c0_7 = arith.constant 0 : index
    %c0_8 = arith.constant 0 : index
    %11 = vector.load %arg9[%c0_7, %c0_8] : memref<8x32xbf16, #tpu.memory_space<vmem>>, vector<8x32xbf16>
    %12 = tpu.iota {dimensions = array<i32: 0>} : vector<8x8xi32>
    %c8_i32 = arith.constant 8 : i32
    %13 = arith.muli %arg1, %c8_i32 : i32
    %14 = vector.broadcast %13 : i32 to vector<8x8xi32>
    %15 = arith.addi %12, %14 : vector<8x8xi32>
    %16 = tpu.iota {dimensions = array<i32: 1>} : vector<8x8xi32>
    %17 = arith.cmpi sle, %16, %15 : vector<8x8xi32>
    %18 = vector.extract_strided_slice %9 {offsets = [0, 0], sizes = [8, 8], strides = [1, 1]} : vector<8x32xbf16> to vector<8x8xbf16>
    %19 = vector.extract_strided_slice %10 {offsets = [0, 0], sizes = [8, 8], strides = [1, 1]} : vector<8x32xbf16> to vector<8x8xbf16>
    %20 = vector.extract_strided_slice %11 {offsets = [0, 0], sizes = [8, 8], strides = [1, 1]} : vector<8x32xbf16> to vector<8x8xbf16>
    %cst_9 = arith.constant dense<0.000000e+00> : vector<8x8xf32>
    %21 = tpu.matmul %18, %19, %cst_9 {dimension_numbers = #tpu.dot_dimension_numbers<[1], [1], [0], [0], [0, 0, 1, 0], [], []>} : vector<8x8xbf16>, vector<8x8xbf16>, vector<8x8xf32> -> vector<8x8xf32>
    %cst_10 = arith.constant 0.353553385 : f32
    %22 = vector.broadcast %cst_10 : f32 to vector<8x8xf32>
    %23 = arith.mulf %21, %22 : vector<8x8xf32>
    %cst_11 = arith.constant 0xFF800000 : f32
    %24 = vector.broadcast %cst_11 : f32 to vector<8x8xf32>
    %25 = arith.select %17, %23, %24 : vector<8x8xi1>, vector<8x8xf32>
    %cst_12 = arith.constant dense<0xFF800000> : vector<8xf32>
    %26 = vector.multi_reduction <maximumf>, %25, %cst_12 [1] : vector<8x8xf32> to vector<8xf32>
    %27 = vector.shape_cast %26 : vector<8xf32> to vector<8x1xf32>
    %28 = vector.broadcast %27 : vector<8x1xf32> to vector<8x8xf32>
    %29 = arith.subf %25, %28 : vector<8x8xf32>
    %30 = math.exp %29 : vector<8x8xf32>
    %cst_13 = arith.constant dense<0.000000e+00> : vector<8xf32>
    %31 = vector.multi_reduction <add>, %30, %cst_13 [1] : vector<8x8xf32> to vector<8xf32>
    %32 = vector.shape_cast %31 : vector<8xf32> to vector<8x1xf32>
    %33 = arith.truncf %30 : vector<8x8xf32> to vector<8x8xbf16>
    %cst_14 = arith.constant dense<0.000000e+00> : vector<8x8xf32>
    %34 = tpu.matmul %33, %20, %cst_14 {dimension_numbers = #tpu.dot_dimension_numbers<[1], [0], [0], [1], [0, 0, 1, 1], [], []>} : vector<8x8xbf16>, vector<8x8xbf16>, vector<8x8xf32> -> vector<8x8xf32>
    %35 = tpu.reciprocal %32 {approx = true} : vector<8x1xf32> -> vector<8x1xf32>
    %36 = vector.broadcast %35 : vector<8x1xf32> to vector<8x8xf32>
    %37 = arith.mulf %34, %36 : vector<8x8xf32>
    %38 = vector.extract_strided_slice %9 {offsets = [0, 8], sizes = [8, 8], strides = [1, 1]} : vector<8x32xbf16> to vector<8x8xbf16>
    %39 = vector.extract_strided_slice %10 {offsets = [0, 8], sizes = [8, 8], strides = [1, 1]} : vector<8x32xbf16> to vector<8x8xbf16>
    %40 = vector.extract_strided_slice %11 {offsets = [0, 8], sizes = [8, 8], strides = [1, 1]} : vector<8x32xbf16> to vector<8x8xbf16>
    %cst_15 = arith.constant dense<0.000000e+00> : vector<8x8xf32>
    %41 = tpu.matmul %38, %39, %cst_15 {dimension_numbers = #tpu.dot_dimension_numbers<[1], [1], [0], [0], [0, 0, 1, 0], [], []>} : vector<8x8xbf16>, vector<8x8xbf16>, vector<8x8xf32> -> vector<8x8xf32>
    %cst_16 = arith.constant 0.353553385 : f32
    %42 = vector.broadcast %cst_16 : f32 to vector<8x8xf32>
    %43 = arith.mulf %41, %42 : vector<8x8xf32>
    %cst_17 = arith.constant 0xFF800000 : f32
    %44 = vector.broadcast %cst_17 : f32 to vector<8x8xf32>
    %45 = arith.select %17, %43, %44 : vector<8x8xi1>, vector<8x8xf32>
    %cst_18 = arith.constant dense<0xFF800000> : vector<8xf32>
    %46 = vector.multi_reduction <maximumf>, %45, %cst_18 [1] : vector<8x8xf32> to vector<8xf32>
    %47 = vector.shape_cast %46 : vector<8xf32> to vector<8x1xf32>
    %48 = vector.broadcast %47 : vector<8x1xf32> to vector<8x8xf32>
    %49 = arith.subf %45, %48 : vector<8x8xf32>
    %50 = math.exp %49 : vector<8x8xf32>
    %cst_19 = arith.constant dense<0.000000e+00> : vector<8xf32>
    %51 = vector.multi_reduction <add>, %50, %cst_19 [1] : vector<8x8xf32> to vector<8xf32>
    %52 = vector.shape_cast %51 : vector<8xf32> to vector<8x1xf32>
    %53 = arith.truncf %50 : vector<8x8xf32> to vector<8x8xbf16>
    %cst_20 = arith.constant dense<0.000000e+00> : vector<8x8xf32>
    %54 = tpu.matmul %53, %40, %cst_20 {dimension_numbers = #tpu.dot_dimension_numbers<[1], [0], [0], [1], [0, 0, 1, 1], [], []>} : vector<8x8xbf16>, vector<8x8xbf16>, vector<8x8xf32> -> vector<8x8xf32>
    %55 = tpu.reciprocal %52 {approx = true} : vector<8x1xf32> -> vector<8x1xf32>
    %56 = vector.broadcast %55 : vector<8x1xf32> to vector<8x8xf32>
    %57 = arith.mulf %54, %56 : vector<8x8xf32>
    %58 = vector.extract_strided_slice %9 {offsets = [0, 16], sizes = [8, 8], strides = [1, 1]} : vector<8x32xbf16> to vector<8x8xbf16>
    %59 = vector.extract_strided_slice %10 {offsets = [0, 16], sizes = [8, 8], strides = [1, 1]} : vector<8x32xbf16> to vector<8x8xbf16>
    %60 = vector.extract_strided_slice %11 {offsets = [0, 16], sizes = [8, 8], strides = [1, 1]} : vector<8x32xbf16> to vector<8x8xbf16>
    %cst_21 = arith.constant dense<0.000000e+00> : vector<8x8xf32>
    %61 = tpu.matmul %58, %59, %cst_21 {dimension_numbers = #tpu.dot_dimension_numbers<[1], [1], [0], [0], [0, 0, 1, 0], [], []>} : vector<8x8xbf16>, vector<8x8xbf16>, vector<8x8xf32> -> vector<8x8xf32>
    %cst_22 = arith.constant 0.353553385 : f32
    %62 = vector.broadcast %cst_22 : f32 to vector<8x8xf32>
    %63 = arith.mulf %61, %62 : vector<8x8xf32>
    %cst_23 = arith.constant 0xFF800000 : f32
    %64 = vector.broadcast %cst_23 : f32 to vector<8x8xf32>
    %65 = arith.select %17, %63, %64 : vector<8x8xi1>, vector<8x8xf32>
    %cst_24 = arith.constant dense<0xFF800000> : vector<8xf32>
    %66 = vector.multi_reduction <maximumf>, %65, %cst_24 [1] : vector<8x8xf32> to vector<8xf32>
    %67 = vector.shape_cast %66 : vector<8xf32> to vector<8x1xf32>
    %68 = vector.broadcast %67 : vector<8x1xf32> to vector<8x8xf32>
    %69 = arith.subf %65, %68 : vector<8x8xf32>
    %70 = math.exp %69 : vector<8x8xf32>
    %cst_25 = arith.constant dense<0.000000e+00> : vector<8xf32>
    %71 = vector.multi_reduction <add>, %70, %cst_25 [1] : vector<8x8xf32> to vector<8xf32>
    %72 = vector.shape_cast %71 : vector<8xf32> to vector<8x1xf32>
    %73 = arith.truncf %70 : vector<8x8xf32> to vector<8x8xbf16>
    %cst_26 = arith.constant dense<0.000000e+00> : vector<8x8xf32>
    %74 = tpu.matmul %73, %60, %cst_26 {dimension_numbers = #tpu.dot_dimension_numbers<[1], [0], [0], [1], [0, 0, 1, 1], [], []>} : vector<8x8xbf16>, vector<8x8xbf16>, vector<8x8xf32> -> vector<8x8xf32>
    %75 = tpu.reciprocal %72 {approx = true} : vector<8x1xf32> -> vector<8x1xf32>
    %76 = vector.broadcast %75 : vector<8x1xf32> to vector<8x8xf32>
    %77 = arith.mulf %74, %76 : vector<8x8xf32>
    %78 = vector.extract_strided_slice %9 {offsets = [0, 24], sizes = [8, 8], strides = [1, 1]} : vector<8x32xbf16> to vector<8x8xbf16>
    %79 = vector.extract_strided_slice %10 {offsets = [0, 24], sizes = [8, 8], strides = [1, 1]} : vector<8x32xbf16> to vector<8x8xbf16>
    %80 = vector.extract_strided_slice %11 {offsets = [0, 24], sizes = [8, 8], strides = [1, 1]} : vector<8x32xbf16> to vector<8x8xbf16>
    %cst_27 = arith.constant dense<0.000000e+00> : vector<8x8xf32>
    %81 = tpu.matmul %78, %79, %cst_27 {dimension_numbers = #tpu.dot_dimension_numbers<[1], [1], [0], [0], [0, 0, 1, 0], [], []>} : vector<8x8xbf16>, vector<8x8xbf16>, vector<8x8xf32> -> vector<8x8xf32>
    %cst_28 = arith.constant 0.353553385 : f32
    %82 = vector.broadcast %cst_28 : f32 to vector<8x8xf32>
    %83 = arith.mulf %81, %82 : vector<8x8xf32>
    %cst_29 = arith.constant 0xFF800000 : f32
    %84 = vector.broadcast %cst_29 : f32 to vector<8x8xf32>
    %85 = arith.select %17, %83, %84 : vector<8x8xi1>, vector<8x8xf32>
    %cst_30 = arith.constant dense<0xFF800000> : vector<8xf32>
    %86 = vector.multi_reduction <maximumf>, %85, %cst_30 [1] : vector<8x8xf32> to vector<8xf32>
    %87 = vector.shape_cast %86 : vector<8xf32> to vector<8x1xf32>
    %88 = vector.broadcast %87 : vector<8x1xf32> to vector<8x8xf32>
    %89 = arith.subf %85, %88 : vector<8x8xf32>
    %90 = math.exp %89 : vector<8x8xf32>
    %cst_31 = arith.constant dense<0.000000e+00> : vector<8xf32>
    %91 = vector.multi_reduction <add>, %90, %cst_31 [1] : vector<8x8xf32> to vector<8xf32>
    %92 = vector.shape_cast %91 : vector<8xf32> to vector<8x1xf32>
    %93 = arith.truncf %90 : vector<8x8xf32> to vector<8x8xbf16>
    %cst_32 = arith.constant dense<0.000000e+00> : vector<8x8xf32>
    %94 = tpu.matmul %93, %80, %cst_32 {dimension_numbers = #tpu.dot_dimension_numbers<[1], [0], [0], [1], [0, 0, 1, 1], [], []>} : vector<8x8xbf16>, vector<8x8xbf16>, vector<8x8xf32> -> vector<8x8xf32>
    %95 = tpu.reciprocal %92 {approx = true} : vector<8x1xf32> -> vector<8x1xf32>
    %96 = vector.broadcast %95 : vector<8x1xf32> to vector<8x8xf32>
    %97 = arith.mulf %94, %96 : vector<8x8xf32>
    %98 = tpu.concatenate %37, %57, %77, %97 in 1 : vector<8x8xf32>, vector<8x8xf32>, vector<8x8xf32>, vector<8x8xf32> -> vector<8x32xf32>
    %99 = arith.truncf %98 : vector<8x32xf32> to vector<8x32xbf16>
    %c0_33 = arith.constant 0 : index
    %c0_34 = arith.constant 0 : index
    %100 = vector.load %arg6[%c0_33, %c0_34] : memref<32x32xf32, #tpu.memory_space<vmem>>, vector<32x32xf32>
    %101 = arith.truncf %100 : vector<32x32xf32> to vector<32x32xbf16>
    %cst_35 = arith.constant dense<0.000000e+00> : vector<8x32xf32>
    %102 = tpu.matmul %99, %101, %cst_35 {dimension_numbers = #tpu.dot_dimension_numbers<[1], [0], [0], [1], [0, 0, 1, 1], [], []>} : vector<8x32xbf16>, vector<32x32xbf16>, vector<8x32xf32> -> vector<8x32xf32>
    %c0_36 = arith.constant 0 : index
    %c0_37 = arith.constant 0 : index
    %c0_38 = arith.constant 0 : index
    %103 = vector.load %arg7[%c0_36, %c0_37, %c0_38] : memref<1x8x32xf32, #tpu.memory_space<vmem>>, vector<1x8x32xf32>
    %104 = vector.shape_cast %103 : vector<1x8x32xf32> to vector<8x32xf32>
    %105 = vector.shape_cast %102 : vector<8x32xf32> to vector<1x8x32xf32>
    tpu.vector_store %arg7[%c0_36, %c0_37, %c0_38], %105 {strides = array<i32>} : memref<1x8x32xf32, #tpu.memory_space<vmem>>, vector<1x8x32xf32>,
    return
  }
  func.func @transform_0(%arg0: i32, %arg1: i32) -> (i32, i32, i32) {
    %c0_i32 = arith.constant 0 : i32
    %c0_i32_0 = arith.constant 0 : i32
    return %arg0, %arg1, %c0_i32 : i32, i32, i32
  }
  func.func @transform_1(%arg0: i32, %arg1: i32) -> (i32, i32, i32) {
    %c0_i32 = arith.constant 0 : i32
    %c0_i32_0 = arith.constant 0 : i32
    %c0_i32_1 = arith.constant 0 : i32
    return %arg0, %c0_i32, %c0_i32_0 : i32, i32, i32
  }
  func.func @transform_2(%arg0: i32, %arg1: i32) -> (i32, i32) {
    %c0_i32 = arith.constant 0 : i32
    %c0_i32_0 = arith.constant 0 : i32
    %c0_i32_1 = arith.constant 0 : i32
    return %c0_i32, %c0_i32_0 : i32, i32
  }
  func.func @transform_3(%arg0: i32, %arg1: i32) -> (i32, i32) {
    %c0_i32 = arith.constant 0 : i32
    %c0_i32_0 = arith.constant 0 : i32
    %c0_i32_1 = arith.constant 0 : i32
    return %c0_i32, %c0_i32_0 : i32, i32
  }
  func.func @transform_4(%arg0: i32, %arg1: i32) -> (i32, i32) {
    %c0_i32 = arith.constant 0 : i32
    %c0_i32_0 = arith.constant 0 : i32
    %c0_i32_1 = arith.constant 0 : i32
    return %c0_i32, %c0_i32_0 : i32, i32
  }
  func.func @transform_5(%arg0: i32, %arg1: i32) -> (i32, i32, i32) {
    %c0_i32 = arith.constant 0 : i32
    %c0_i32_0 = arith.constant 0 : i32
    return %arg0, %arg1, %c0_i32 : i32, i32, i32
  }
}

</mosaic_0001>

<bundles_post_ra>
// kernel: multi_head_attention.1
= control target key start
LH: loop header
LB: loop body
LE: loop exit
PB: predicated region body
PF: predicated region fallthrough
CT: control target
= control target key end

     0   :  { %10 = vsyncpa [#allocation5], 0  ;;  %s1566_s0 = inlined_call_operand.vmem [shape: f32[2,8,32], index: 0, kind: input, shape index: {}, may-alias: {0,1}]   ;;  %s1567_s1 = inlined_call_operand.vmem [shape: f32[2,8,32], index: 1, kind: input, shape index: {}, may-alias: {0,1}]   ;;  %s1568_s2 = inlined_call_operand.vmem [shape: f32[32,32], index: 2, kind: input, shape index: {}]   ;;  %s1569_s3 = inlined_call_operand.vmem [shape: f32[32,64], index: 3, kind: input, shape index: {}]   ;;  %s1570_s4 = inlined_call_operand.vmem [shape: f32[32,32], index: 4, kind: input, shape index: {}]   ;;  %s1571_s5 = inlined_call_operand.hbm [shape: f32[2,8,32], index: 5, kind: output, shape index: {}]  }
   0x1   :  { %12 = vsyncpa [#allocation5 + $0x1], 0  ;;  %s1335_s18 = smov 0   ;;  %s1337_s19 = smov 0  }
   0x2   :  { %s1339_s20 = smov 0   ;;  %s1341_s21 = smov 0  }
   0x3   :  { %s1343_s22 = smov 0   ;;  %s1345_s23 = smov 0  }
   0x4 LB: > { %s1009_s24 = sadd.s32 4294967295, %s1293_s23   ;;  %s1010_s25 = sadd.s32 4294967294, %s1293_s23   ;;  %s1293_s23 = sphi %s1345_s23, %s18_s23   ;;  %s1289_s22 = sphi %s1343_s22, %s1578_s22   ;;  %s1285_s21 = sphi %s1341_s21, %s1577_s21   ;;  %s1281_s20 = sphi %s1339_s20, %s1576_s20   ;;  %s1277_s19 = sphi %s1337_s19, %s1575_s19   ;;  %s1273_s18 = sphi %s1335_s18, %s1574_s18  }
   0x5   : > { %s30_s26 = sadd.s32 1, %s1289_s22  ;;  %s156_s27 = sadd.s32 1, %s1281_s20 }
   0x6   : > { %p32_p0 = scmp.ge.s32.totalorder %s30_s26, 2  ;;  %p166_p1 = scmp.ne.s32.totalorder %s1281_s20, %s1277_s19 }
   0x7   : > { %p167_p2 = scmp.eq.s32.totalorder %s1009_s24, 1  ;;  %p172_p3 = scmp.ne.s32.totalorder %s1277_s19, %s1273_s18 }
   0x8   : > { %s1580_s26 = smov (%p32_p0, %s30_s26), 0  ;;  %p173_p5 = scmp.eq.s32.totalorder %s1010_s25, 1 }
   0x9   : > { %p1375_p4 = por %p167_p2, %p166_p1  ;;  %s151_s29 = ssub.s32 %s1289_s22, %s1580_s26 }
   0xa   : > { %p1013_p6 = scmp.ge.s32.totalorder %s1293_s23, 1  ;;  %p154_p7 = scmp.eq.s32.totalorder %s151_s29, 0 }
   0xb   : > { %p1382_p8 = por %p173_p5, %p172_p3  ;;  %p217_p9 = scmp.lt.s32.totalorder %s1293_s23, 3 }
   0xc   : > { %s1388_s6 = scalar_select %p154_p7, %s1281_s20, %s156_s27  }
   0xd   : > { %p218_p10 = pnand %p1013_p6, %p217_p9 }
   0xe   : > { %v269_v0 = vld [vmem:[%s1569_s3] sm:$0xff] (!%p218_p10)  ;;  %v270_v1 = vld [vmem:[%s1569_s3 + $0x8] sm:$0xff] (!%p218_p10)  ;;  %v271_v2 = vld [vmem:[%s1569_s3 + $0x10] sm:$0xff] (!%p218_p10)  ;;  %p251_p11 = scmp.lt.s32.totalorder (!%p218_p10), %s1285_s21, 1  ;;  %v1295_v3 = vmov (!%p218_p10), 0.0   ;;  %vm1296_vm0 = vmmov (!%p218_p10), 0   ;;  %v384_v42 = vlaneseq (!%p218_p10) }
   0xf   : > { %221 = sbr.rel (%p218_p10) target bundleno = 1326 (0x52e), region = 40  ;;  %1061 = vmatprep.subr.bf16.mxu0 (!%p218_p10), %v1295_v3  ;;  %v273_v4 = vpack.c.bf16 (!%p218_p10), %v270_v1, %v269_v0  ;;  %v272_v5 = vld [vmem:[%s1569_s3 + $0x18] sm:$0xff] (!%p218_p10)  ;;  %1065 = vmatprep.mubr.msk.bf16.mxu0 (!%p218_p10), %vm1296_vm0, %v1295_v3  ;;  %v331_v6 = vld [vmem:[%s1568_s2] sm:$0xff] (!%p218_p10)  ;;  %v332_v7 = vld [vmem:[%s1568_s2 + $0x8] sm:$0xff] (!%p218_p10)  ;;  %vm275_vm1 = vcmask (!%p218_p10), 261120   ;;  %vm320_vm2 = vcmask (!%p218_p10), 257024  }
  0x10   : > { %1069 = vmatprep.subr.bf16.mxu1 (!%p218_p10), %v1295_v3  ;;  %v335_v8 = vpack.c.bf16 (!%p218_p10), %v332_v7, %v331_v6  ;;  %v333_v9 = vld [vmem:[%s1568_s2 + $0x10] sm:$0xff] (!%p218_p10)  ;;  %v334_v10 = vld [vmem:[%s1568_s2 + $0x18] sm:$0xff] (!%p218_p10)  ;;  %1073 = vmatprep.mubr.msk.bf16.mxu1 (!%p218_p10), %vm1296_vm0, %v1295_v3  ;;  %v274_v11 = vpack.c.bf16 (!%p218_p10), %v272_v5, %v271_v2  ;;  %vm392_vm3 = vcmask (!%p218_p10), 64512   ;;  %s1297_s16 = smov (!%p218_p10), 112   ;;  %s1298_s17 = smov (!%p218_p10), 120   ;;  %vm454_vm4 = vcmask (!%p218_p10), 1043456  }
  0x11   : > { %1062 = vmatpush3.bf16.msra.mxu0 (!%p218_p10), %v273_v4  ;;  %v336_v12 = vpack.c.bf16 (!%p218_p10), %v334_v10, %v333_v9  ;;  %s1299_s24 = smov (!%p218_p10), 104   ;;  %v385_v43 = vshrl.u32 (!%p218_p10), %v384_v42, 7  ;;  %v390_v44 = vand.u32 (!%p218_p10), 127, %v384_v42  ;;  %s1302_s14 = smov (!%p218_p10), 16   ;;  %vm856_vm6 = vcmask (!%p218_p10), 130048  }
  0x12   : > { %1063 = vmatprep.subr.bf16.mxu0 (!%p218_p10), %v1295_v3  ;;  %1070 = vmatpush3.bf16.msra.mxu1 (!%p218_p10), %v335_v8  ;;  %vm858_vm7 = vcmask (!%p218_p10), 195584  }
  0x13   : > { %1071 = vmatprep.subr.bf16.mxu1 (!%p218_p10), %v1295_v3  ;;  %vm391_vm5 = vcmp.le.s32.totalorder (!%p218_p10), %v390_v44, %v385_v43 }
  0x15   : > { %1064 = vmatpush3.bf16.msra.mxu0 (!%p218_p10), %v274_v11 }
  0x16   : > { %s252_s25 = scalar_select %p251_p11, %s1285_s21, 1  ;;  %1072 = vmatpush3.bf16.msra.mxu1 %v336_v12  ;;  %1077 = vmatprep.subr.bf16.mxu0 %v1295_v3 }
  0x17   : > { %1083 = vmatprep.subr.bf16.mxu1 %v1295_v3 }
  0x18   : > { %s1015_s9 = sshll.u32 %s252_s25, 3  ;;  %s1300_s25 = smov 96  }
  0x19   : > { %s261_s12 = scalar_lea.vmem %s1567_s1, %s1015_s9  ;;  %s257_s15 = scalar_lea.vmem %s1566_s0, %s1015_s9 }
  0x1a   : > { %v267_v13 = vld [vmem:[%s261_s12] sm:$0xff]  ;;  %s1301_s9 = smov 8  }
  0x1b   : > { %v329_v14 = vld [vmem:[%s257_s15] sm:$0xff]  ;;  %v268_v15 = vpack.c.bf16 %v267_v13, %v267_v13  ;;  %s1303_s15 = smov 24  }
  0x1c   : > { %v330_v16 = vpack.c.bf16 %v329_v14, %v329_v14 }
  0x1d   : > { %1066 = vmatmul.mubr.msk.bf16.vlgmr.msra.gmra.mrb[0].mxu0 %vm275_vm1, %v268_v15 }
  0x1e   : > { %1074 = vmatmul.mubr.msk.bf16.vlgmr.msra.gmra.mrb[0].mxu1 %vm275_vm1, %v330_v16  ;;  %1079 = vmatprep.mubr.msk.bf16.mxu0 %vm1296_vm0, %v1295_v3 }
  0x1f   : > { %1085 = vmatprep.mubr.msk.bf16.mxu1 %vm1296_vm0, %v1295_v3 }
  0xf0   : > { %v313_v17 = vpop.f32.mrb[0].mxu0 }
  0xf1   : > { %v319_v18 = vpack.c.bf16 %v313_v17, %v313_v17  ;;  %v1067_v19 = vpop.f32.mrb[1].mxu0  ;;  %v375_v20 = vpop.f32.mrb[0].mxu1 }
  0xf2   : > { %v316_v21 = vpop.f32.mrb[2].mxu0  ;;  %v1075_v22 = vpop.f32.mrb[1].mxu1  ;;  %v381_v29 = vpack.c.bf16 %v375_v20, %v375_v20 }
  0xf3   : > { %321 = vst.msk [vmem:[#allocation2] sm:$0xf] %vm320_vm2, %v319_v18  ;;  %v1068_v23 = vpop.f32.mrb[3].mxu0  ;;  %v378_v24 = vpop.f32.mrb[2].mxu1 }
  0xf4   : > { %v1076_v25 = vpop.f32.mrb[3].mxu1 }
  0xfa   : > { %v382_v26 = vld [vmem:[#allocation2] sm:$0xf] }
  0xfb   : > { %v397_v27 = vsel %vm392_vm3, %v382_v26, 0  ;;  %v1022_v28 = vcombine.low %v382_v26, %v382_v26 }
  0xfc   : > { %1078 = vmatpush3.bf16.xpose.msra.mxu0 %v397_v27 }
  0xfd   : > { %621 = vrot.lane.b32.xlu1 %v1022_v28, %s1297_s16  ;;  %506 = vrot.lane.b32.xlu0 %v1022_v28, %s1298_s17 }
  0xfe   : > { %1089 = vmatprep.subr.bf16.mxu0 %v1295_v3 }
 0x101   : > { %619 = vrot.lane.b32.xlu1 %v381_v29, %s1297_s16  ;;  %501 = vrot.lane.b32.xlu0 %v381_v29, %s1298_s17 }
 0x103   : > { %1080 = vmatmul.mubr.msk.bf16.vlgmr.msra.gmra.mrb[4].mxu0 %vm392_vm3, %v381_v29 }
 0x104   : > { %1091 = vmatprep.mubr.msk.bf16.mxu0 %vm1296_vm0, %v1295_v3 }
 0x105   : > { %731 = vrot.lane.b32.xlu1 %v381_v29, %s1299_s24  ;;  %733 = vrot.lane.b32.xlu0 %v1022_v28, %s1299_s24 }
 0x109   : > { %325 = vrot.lane.b32.xlu0 %v319_v18, %s1300_s25 }
 0x16f   : > { %v507_v30 = vpop.permute.xlu0 %506  ;;  %v622_v33 = vpop.permute.xlu1 %621 }
 0x170   : > { %v512_v31 = vsel %vm392_vm3, %v507_v30, 0  ;;  %v627_v35 = vsel %vm392_vm3, %v622_v33, 0 }
 0x171   : > { %1090 = vmatpush3.bf16.xpose.msra.mxu0 %v512_v31 }
 0x172   : > { %1101 = vmatprep.subr.bf16.mxu0 %v1295_v3 }
 0x173   : > { %v502_v32 = vpop.permute.xlu0 %501  ;;  %v620_v37 = vpop.permute.xlu1 %619 }
 0x177   : > { %v734_v34 = vpop.permute.xlu0 %733  ;;  %v732_v41 = vpop.permute.xlu1 %731 }
 0x178   : > { %1092 = vmatmul.mubr.msk.bf16.vlgmr.msra.gmra.mrb[8].mxu0 %vm392_vm3, %v502_v32  ;;  %v739_v38 = vsel %vm392_vm3, %v734_v34, 0 }
 0x179   : > { %1102 = vmatpush3.bf16.xpose.msra.mxu0 %v627_v35  ;;  %1103 = vmatprep.mubr.msk.bf16.mxu0 %vm1296_vm0, %v1295_v3 }
 0x17a   : > { %1113 = vmatprep.subr.bf16.mxu0 %v1295_v3 }
 0x17b   : > { %v326_v36 = vpop.permute.xlu0 %325 }
 0x17c   : > { %328 = vst.msk [vmem:[#allocation3] sm:$0xf] %vm320_vm2, %v326_v36 }
 0x180   : > { %1104 = vmatmul.mubr.msk.bf16.vlgmr.msra.gmra.mrb[12].mxu0 %vm392_vm3, %v620_v37 }
 0x181   : > { %1114 = vmatpush3.bf16.xpose.msra.mxu0 %v739_v38  ;;  %1115 = vmatprep.mubr.msk.bf16.mxu0 %vm1296_vm0, %v1295_v3 }
 0x182   : > { %1125 = vmatprep.subr.bf16.mxu0 %v1295_v3 }
 0x183   : > { %v383_v39 = vld [vmem:[#allocation3] sm:$0xf] }
 0x184   : > { %v456_v40 = vsel %vm454_vm4, %v383_v39, 0  ;;  %v1024_v52 = vcombine.low %v383_v39, %v383_v39 }
 0x185   : > { %1084 = vmatpush3.bf16.msra.mxu1 %v456_v40 }
 0x186   : > { %1095 = vmatprep.subr.bf16.mxu1 %v1295_v3 }
 0x188   : > { %1116 = vmatmul.mubr.msk.bf16.vlgmr.msra.gmra.mrb[16].mxu0 %vm392_vm3, %v732_v41 }
 0x189   : > { %1129 = vmatprep.mubr.msk.bf16.mxu0 %vm1296_vm0, %v1295_v3 }
 0x1d6   : > { %v433_v45 = vpop.f32.mrb[4].mxu0 }
 0x1d7   : > { %v439_v46 = vmul.f32 0.35355338, %v433_v45  ;;  %v1081_v47 = vpop.f32.mrb[5].mxu0 }
 0x1d8   : > { %v436_v48 = vpop.f32.mrb[6].mxu0  ;;  %v861_v47 = vld [vmem:[%s1570_s4] sm:$0xff] }
 0x1d9   : > { %v1082_v49 = vpop.f32.mrb[7].mxu0  ;;  %v440_v50 = vsel %vm391_vm5, %v439_v46, -inf  ;;  %v862_v48 = vld [vmem:[%s1570_s4 + $0x8] sm:$0xff] }
 0x1da   : > { %v441_v51 = vsel %vm392_vm3, %v440_v50, -inf  ;;  %v865_v49 = vpack.c.bf16 %v862_v48, %v861_v47 }
 0x1db   : > { %442 = vmax.xlane.f32.xlu1 %v441_v51 }
 0x1dc   : > { %1126 = vmatpush3.bf16.msra.mxu0 %v865_v49 }
 0x1dd   : > { %1127 = vmatprep.subr.bf16.mxu0 %v1295_v3 }
 0x1ec   : > { %681 = vrot.lane.b32.xlu1 %v1024_v52, %s1297_s16  ;;  %s248_s16 = sand.u32 1, %s1277_s19  }
 0x24b   : > { %v548_v53 = vpop.f32.mrb[8].mxu0 }
 0x24c   : > { %v554_v54 = vmul.f32 0.35355338, %v548_v53  ;;  %v1093_v55 = vpop.f32.mrb[9].mxu0 }
 0x24d   : > { %v551_v56 = vpop.f32.mrb[10].mxu0 }
 0x24e   : > { %v1094_v57 = vpop.f32.mrb[11].mxu0  ;;  %v555_v58 = vsel %vm391_vm5, %v554_v54, -inf }
 0x24f   : > { %v556_v59 = vsel %vm392_vm3, %v555_v58, -inf  ;;  %v863_v57 = vld [vmem:[%s1570_s4 + $0x10] sm:$0xff] }
 0x250   : > { %557 = vmax.xlane.f32.xlu0 %v556_v59 }
 0x253   : > { %v663_v60 = vpop.f32.mrb[12].mxu0 }
 0x254   : > { %v669_v61 = vmul.f32 0.35355338, %v663_v60  ;;  %v1105_v62 = vpop.f32.mrb[13].mxu0 }
 0x255   : > { %v666_v63 = vpop.f32.mrb[14].mxu0 }
 0x256   : > { %v1106_v0 = vpop.f32.mrb[15].mxu0  ;;  %v670_v1 = vsel %vm391_vm5, %v669_v61, -inf }
 0x257   : > { %v671_v2 = vsel %vm392_vm3, %v670_v1, -inf }
 0x258   : > { %672 = vmax.xlane.f32.xlu0 %v671_v2 }
 0x25b   : > { %v775_v4 = vpop.f32.mrb[16].mxu0 }
 0x25c   : > { %v781_v5 = vmul.f32 0.35355338, %v775_v4  ;;  %v1117_v6 = vpop.f32.mrb[17].mxu0 }
 0x25d   : > { %v778_v7 = vpop.f32.mrb[18].mxu0 }
 0x25e   : > { %v1118_v8 = vpop.f32.mrb[19].mxu0  ;;  %v782_v9 = vsel %vm391_vm5, %v781_v5, -inf }
 0x25f   : > { %v783_v10 = vsel %vm392_vm3, %v782_v9, -inf }
 0x260   : > { %784 = vmax.xlane.f32.xlu1 %v783_v10 }
 0x268   : > { %v443_v11 = vpop.xlane.xlu1 %442 }
 0x269   : > { %v444_v12 = vsub.f32 %v440_v50, %v443_v11 }
 0x26b   : > { %v445_v13 = vmul.f32 1.442695, %v444_v12 }
 0x26c   : > { %v682_v22 = vpop.permute.xlu1 %681 }
 0x26d   : > { %1199 = vpow2.f32 %v445_v13  ;;  %v687_v30 = vsel %vm454_vm4, %v682_v22, 0 }
 0x26e   : > { %569 = vrot.lane.b32.xlu0 %v1024_v52, %s1298_s17  ;;  %s1014_s17 = sshll.u32 %s248_s16, 3 }
 0x26f   : > { %s250_s25 = scalar_lea.vmem [#allocation4], %s1014_s17 }
 0x270   : > { %s926_s27 = sshll.u32 %s250_s25, 4  ;;  %s1520_s27 = int_to_ptr.vmem [resolvable:$true] %s926_s27 }
 0x271   : > { %793 = vrot.lane.b32.xlu1 %v1024_v52, %s1299_s24  ;;  %s1032_s24 = sshll.u32 %s1285_s21, 7  ;;  %s1215_s10 = scalar_lea.vmem %s1520_s27, 128 }
 0x272   : > { %s1518_s8 = scalar_lea.hbm %s1571_s5, %s1032_s24  ;;  %p1216_p12 = scmp.ne.s32.totalorder %s1520_s27, %s1215_s10 }
 0x273   : > { %s1304_s21 = smov [#allocation4]  }
 0x274   : > { %p1217_p13 = pnand %p1216_p12, %p1375_p4  ;;  %s1219_s11 = sshll.u32 %s1304_s21, 4  ;;  %s1220_s11 = int_to_ptr.vmem [resolvable:$false] %s1219_s11 }
 0x275   : > { %s1221_s12 = scalar_lea.vmem %s1220_s11, 256  ;;  %p1222_p1 = scmp.lt.s32.totalorder %s1520_s27, %s1220_s11 }
 0x276   : > { %p1218_p0 = pneg %p1217_p13  ;;  %p1223_p2 = scmp.lt.s32.totalorder %s1221_s12, %s1215_s10 }
 0x277   : > { %v1200_v14 = vpop.eup %1199 }
 0x278   : > { %v450_v15 = vpack.c.bf16 %v1200_v14, %v1200_v14  ;;  %v447_v40 = vsel %vm392_vm3, %v1200_v14, 0.0  ;;  %p1224_p3 = por %p1223_p2, %p1222_p1 }
 0x27a   : > { %1086 = vmatmul.mubr.msk.bf16.vlgmr.msra.gmra.mrb[4].mxu1 %vm392_vm3, %v450_v15  ;;  %p1225_p5 = pnand %p1224_p3, %p1218_p0 }
 0x27b   : > { %1097 = vmatprep.mubr.msk.bf16.mxu1 %vm1296_vm0, %v1295_v3 }
 0x2dd   : > { %v558_v16 = vpop.xlane.xlu0 %557 }
 0x2de   : > { %v559_v17 = vsub.f32 %v555_v58, %v558_v16  ;;  %v864_v58 = vld [vmem:[%s1570_s4 + $0x18] sm:$0xff] }
 0x2df   : > { %v866_v59 = vpack.c.bf16 %v864_v58, %v863_v57 }
 0x2e0   : > { %v560_v18 = vmul.f32 1.442695, %v559_v17 }
 0x2e1   : > { %1128 = vmatpush3.bf16.msra.mxu0 %v866_v59 }
 0x2e2   : > { %1201 = vpow2.f32 %v560_v18 }
 0x2e5   : > { %v673_v19 = vpop.xlane.xlu0 %672 }
 0x2e6   : > { %v674_v20 = vsub.f32 %v670_v1, %v673_v19 }
 0x2e8   : > { %v675_v21 = vmul.f32 1.442695, %v674_v20 }
 0x2e9   : > { %v570_v23 = vpop.permute.xlu0 %569 }
 0x2ea   : > { %1203 = vpow2.f32 %v675_v21  ;;  %v575_v24 = vsel %vm454_vm4, %v570_v23, 0 }
 0x2eb   : > { %1096 = vmatpush3.bf16.msra.mxu1 %v575_v24 }
 0x2ec   : > { %v1202_v25 = vpop.eup %1201  ;;  %1107 = vmatprep.subr.bf16.mxu1 %v1295_v3 }
 0x2ed   : > { %v785_v26 = vpop.xlane.xlu1 %784  ;;  %v562_v27 = vsel %vm392_vm3, %v1202_v25, 0.0  ;;  %v565_v28 = vpack.c.bf16 %v1202_v25, %v1202_v25 }
 0x2ee   : > { %v786_v29 = vsub.f32 %v782_v9, %v785_v26  ;;  %563 = vadd.xlane.f32.xlu0 %v562_v27 }
 0x2ef   : > { %1098 = vmatmul.mubr.msk.bf16.vlgmr.msra.gmra.mrb[8].mxu1 %vm392_vm3, %v565_v28 }
 0x2f0   : > { %v787_v31 = vmul.f32 1.442695, %v786_v29  ;;  %1108 = vmatpush3.bf16.msra.mxu1 %v687_v30  ;;  %1109 = vmatprep.mubr.msk.bf16.mxu1 %vm1296_vm0, %v1295_v3 }
 0x2f1   : > { %1119 = vmatprep.subr.bf16.mxu1 %v1295_v3  ;;  %v794_v33 = vpop.permute.xlu1 %793 }
 0x2f2   : > { %1205 = vpow2.f32 %v787_v31  ;;  %v799_v36 = vsel %vm454_vm4, %v794_v33, 0 }
 0x2f4   : > { %v1204_v32 = vpop.eup %1203 }
 0x2f5   : > { %v677_v34 = vsel %vm392_vm3, %v1204_v32, 0.0  ;;  %v680_v35 = vpack.c.bf16 %v1204_v32, %v1204_v32 }
 0x2f6   : > { %678 = vadd.xlane.f32.xlu1 %v677_v34 }
 0x2f7   : > { %1110 = vmatmul.mubr.msk.bf16.vlgmr.msra.gmra.mrb[12].mxu1 %vm392_vm3, %v680_v35 }
 0x2f8   : > { %1120 = vmatpush3.bf16.msra.mxu1 %v799_v36  ;;  %1121 = vmatprep.mubr.msk.bf16.mxu1 %vm1296_vm0, %v1295_v3 }
 0x2fc   : > { %v1206_v37 = vpop.eup %1205 }
 0x2fd   : > { %v789_v38 = vsel %vm392_vm3, %v1206_v37, 0.0  ;;  %v792_v39 = vpack.c.bf16 %v1206_v37, %v1206_v37 }
 0x2fe   : > { %790 = vadd.xlane.f32.xlu0 %v789_v38 }
 0x2ff   : > { %1122 = vmatmul.mubr.msk.bf16.vlgmr.msra.gmra.mrb[16].mxu1 %vm392_vm3, %v792_v39 }
 0x302   : > { %448 = vadd.xlane.f32.xlu0 %v447_v40 }
 0x34d   : > { %v492_v41 = vpop.f32.mrb[4].mxu1 }
 0x34e   : > { %v1087_v42 = vpop.f32.mrb[5].mxu1 }
 0x34f   : > { %v495_v43 = vpop.f32.mrb[6].mxu1 }
 0x350   : > { %v1088_v44 = vpop.f32.mrb[7].mxu1 }
 0x37b   : > { %v564_v45 = vpop.xlane.xlu0 %563 }
 0x37c   : > { %1207 = vrcp.f32 %v564_v45 }
 0x383   : > { %v679_v46 = vpop.xlane.xlu1 %678 }
 0x384   : > { %1209 = vrcp.f32 %v679_v46 }
 0x386   : > { %v1208_v50 = vpop.eup %1207 }
 0x38b   : > { %v791_v55 = vpop.xlane.xlu0 %790 }
 0x38c   : > { %1211 = vrcp.f32 %v791_v55 }
 0x38e   : > { %v1210_v60 = vpop.eup %1209 }
 0x38f   : > { %v449_v8 = vpop.xlane.xlu0 %448 }
 0x390   : > { %1213 = vrcp.f32 %v449_v8 }
 0x396   : > { %v1212_v1 = vpop.eup %1211 }
 0x39a   : > { %v1214_v9 = vpop.eup %1213 }
 0x39b   : > { %v499_v11 = vmul.f32 %v1214_v9, %v492_v41 }
 0x3c2   : > { %v611_v51 = vpop.f32.mrb[8].mxu1 }
 0x3c3   : > { %v618_v52 = vmul.f32 %v1208_v50, %v611_v51  ;;  %v1099_v53 = vpop.f32.mrb[9].mxu1 }
 0x3c4   : > { %v614_v54 = vpop.f32.mrb[10].mxu1 }
 0x3c5   : > { %844 = vrot.lane.b32.xlu1 %v618_v52, %s1301_s9  ;;  %v1100_v56 = vpop.f32.mrb[11].mxu1  ;;  %s912_s9 = scalar_lea.sflag [#allocation5], %s248_s16 }
 0x3ca   : > { %v723_v61 = vpop.f32.mrb[12].mxu1 }
 0x3cb   : > { %v730_v62 = vmul.f32 %v1210_v60, %v723_v61  ;;  %v1111_v63 = vpop.f32.mrb[13].mxu1 }
 0x3cc   : > { %v726_v3 = vpop.f32.mrb[14].mxu1 }
 0x3cd   : > { %848 = vrot.lane.b32.xlu0 %v730_v62, %s1302_s14  ;;  %v1112_v0 = vpop.f32.mrb[15].mxu1 }
 0x3d2   : > { %v835_v2 = vpop.f32.mrb[16].mxu1 }
 0x3d3   : > { %v842_v4 = vmul.f32 %v1212_v1, %v835_v2  ;;  %v1123_v5 = vpop.f32.mrb[17].mxu1 }
 0x3d4   : > { %v838_v6 = vpop.f32.mrb[18].mxu1 }
 0x3d5   : > { %852 = vrot.lane.b32.xlu1 %v842_v4, %s1303_s15  ;;  %v1124_v7 = vpop.f32.mrb[19].mxu1 }
 0x437   : > { %v845_v10 = vpop.permute.xlu1 %844 }
 0x438   : > { %v855_v13 = vsel %vm392_vm3, %v499_v11, %v845_v10 }
 0x43f   : > { %v849_v12 = vpop.permute.xlu0 %848 }
 0x440   : > { %v857_v14 = vsel %vm856_vm6, %v855_v13, %v849_v12 }
 0x447   : > { %v853_v15 = vpop.permute.xlu1 %852 }
 0x448   : > { %v859_v16 = vsel %vm858_vm7, %v857_v14, %v853_v15 }
 0x449   : > { %v860_v17 = vpack.c.bf16 %v859_v16, %v859_v16 }
 0x44b   : > { %1130 = vmatmul.mubr.msk.bf16.vlgmr.msra.gmra.mrb[20].mxu0 %vm275_vm1, %v860_v17 }
 0x51e   : > { %v904_v18 = vpop.f32.mrb[20].mxu0 }
 0x51f   : > { %910 = vst.msk [vmem:[%s250_s25] sm:$0xff] %vm275_vm1, %v904_v18  ;;  %v1131_v19 = vpop.f32.mrb[21].mxu0 }
 0x520   : > { %v907_v20 = vpop.f32.mrb[22].mxu0 }
 0x521   : > { %1228 = shalt.err (!%p1225_p5)
}
 0x522   : > { %s1229_s13 = scalar_lea.hbm %s1518_s8, 128  ;;  %s1233_s16 = scalar_lea.hbm %s1571_s5, 256 }
 0x523   : > { %p1230_p6 = scmp.ne.s32.totalorder %s1518_s8, %s1229_s13  ;;  %p1234_p10 = scmp.lt.u32.totalorder %s1518_s8, %s1571_s5 }
 0x524   : > { %p1235_p11 = scmp.lt.u32.totalorder %s1233_s16, %s1229_s13  ;;  %p1237_p13 = scmp.lt.u32.totalorder %s1229_s13, %s1518_s8 }
 0x525   : > { %p1231_p7 = pnand %p1230_p6, %p1375_p4 }
 0x526   : > { %p1236_p12 = por %p1235_p11, %p1234_p10 }
 0x527   : > { %p1232_p9 = pneg %p1231_p7 }
 0x528   : > { %p1238_p0 = por %p1237_p13, %p1236_p12 }
 0x52a   : > { %p1239_p1 = pnand %p1238_p0, %p1232_p9 }
 0x52c   : > { %1242 = shalt.err (!%p1239_p1)
}
 0x52d   : > { %1133 = dma.vmem_to_hbm [thread:$0]  (%p1375_p4), %s1520_s27, 128, %s1518_s8, %s912_s9   ;;  %v1132_v21 = vpop.f32.mrb[23].mxu0 }
 0x52e PF: > { %p1139_p2 = scmp.ge.s32.totalorder %s1293_s23, 2  ;;  %s938_s25 = sand.u32 1, %s1273_s18  }
 0x52f   : > { %s939_s29 = scalar_lea.sflag [#allocation5], %s938_s25 }
 0x530   : > { %p1136_p3 = pnand %p1139_p2, %p1382_p8 }
 0x532   : > { %1268 = dma.done.wait (!%p1136_p3), %s939_s29, 128  }
 0x533   : > { %1270 = vsyncadd (!%p1136_p3), %s939_s29, 4294967168  ;;  %s18_s23 = sadd.s32 1, %s1293_s23   ;;  %s1574_s18 = smov %s1277_s19 }
 0x534   : > { %p15_p5 = scmp.ge.s32.totalorder %s18_s23, 4   ;;  %s1575_s19 = smov %s1281_s20 }
 0x535   : > { %s1576_s20 = smov %s1388_s6  ;;  %s1577_s21 = smov %s1289_s22 }
 0x536   : > { %s1578_s22 = smov %s1580_s26  ;;  %17 = sbr.rel (!%p15_p5) target bundleno = 4 (0x4), region = 82 }
 0x53d   :  { %944 = vsyncpa [#allocation5], 1 }
 0x53e   :  { %946 = vsyncpa [#allocation5 + $0x1], 1 }

</bundles_post_ra>
